<compile_context>
chip_gen: v7x
topology: tpu7x:2x2x1
jax: 0.10.0
libtpu: 0.0.40
codegen_flags: <defaults>
</compile_context>

<pallas_src>
import math
from functools import partial

import jax
import jax.numpy as jnp
from jax import lax
from jax.experimental import pallas as pl
from jax.experimental.pallas import tpu as pltpu


def _round_up(x, m):
    return ((x + m - 1) // m) * m


def slab_layout(n_bidders, hidden):
    """Static layout of the packed parameter slab.

    Returns (layout, rows, lanes, bias_col); layout is a tuple of
    (row_offset, out_dim, in_dim) per matmul: shared layers, then the fused
    [alloc_head; pay_head] layer.
    """
    ins = [n_bidders] + list(hidden)
    outs = list(hidden) + [2 * n_bidders]
    layout = []
    row = 0
    for out_d, in_d in zip(outs, ins):
        layout.append((row, out_d, in_d))
        row += _round_up(out_d, 8)
    rows = _round_up(row, 8)
    lanes = _round_up(max(ins) + 1, 128)
    bias_col = lanes - 1
    return tuple(layout), rows, lanes, bias_col


def init_linear(key, fan_in, fan_out, dtype=jnp.float32):
    """PyTorch nn.Linear default init; weight stored (out, in) like PyTorch."""
    kw, kb = jax.random.split(key)
    bound = 1.0 / math.sqrt(fan_in)
    w = jax.random.uniform(kw, (fan_out, fan_in), dtype, -bound, bound)
    b = jax.random.uniform(kb, (fan_out,), dtype, -bound, bound)
    return w, b


def make_params(key, n_bidders, hidden=(64, 32, 16)):
    keys = jax.random.split(key, len(hidden) + 2)
    params = []
    dim = n_bidders
    for i, h in enumerate(hidden):
        w, b = init_linear(keys[i], dim, h)
        params += [w, b]
        dim = h
    wa, ba = init_linear(keys[len(hidden)], dim, n_bidders)
    wp, bp = init_linear(keys[len(hidden) + 1], dim, n_bidders)
    params += [wa, ba, wp, bp]
    return params


def pack_params(params, n_bidders, hidden):
    """Pack PyTorch-layout (out,in) weights + (out,) biases into one f32 slab."""
    nl = len(hidden)
    shared = [(params[2 * i], params[2 * i + 1]) for i in range(nl)]
    wa, ba = params[2 * nl], params[2 * nl + 1]
    wp, bp = params[2 * nl + 2], params[2 * nl + 3]
    mats = shared + [(jnp.concatenate([wa, wp], axis=0),
                      jnp.concatenate([ba, bp], axis=0))]
    layout, rows, lanes, bias_col = slab_layout(n_bidders, hidden)
    slab = jnp.zeros((rows, lanes), jnp.float32)
    for (row, out_d, in_d), (w, b) in zip(layout, mats):
        slab = slab.at[row:row + out_d, 0:in_d].set(w.astype(jnp.float32))
        slab = slab.at[row:row + out_d, bias_col].set(b.astype(jnp.float32))
    return slab


def auction_kernel(x_ref, p_ref, alloc_ref, pay_ref, *,
                   layout, n_bidders, bias_col):
    x = x_ref[...]                                  # (n_bidders, TB), batch on lanes
    z = x
    n_layers = len(layout)
    for li, (row, out_d, in_d) in enumerate(layout):
        w = p_ref[row:row + out_d, 0:in_d]                    # (out, in)
        b = p_ref[row:row + out_d, bias_col:bias_col + 1]     # (out, 1)
        z = jnp.dot(w, z, preferred_element_type=jnp.float32) + b
        if li < n_layers - 1:                       # shared layers get ReLU
            z = jnp.maximum(z, 0.0)
    # z is the fused head output: (2*n_bidders, TB)
    logits = z[:n_bidders]                          # alloc head
    plogits = z[n_bidders:]                         # pay head

    # softmax over bidders = 4-row sublane reduce; reciprocal on the EUP
    m = jnp.max(logits, axis=0, keepdims=True)
    e = jnp.exp(logits - m)
    denom = jnp.sum(e, axis=0, keepdims=True)
    alloc = e * pl.reciprocal(denom, approx=True)

    frac = lax.logistic(plogits)                    # robust sigmoid (EUP)
    pay = frac * x * alloc

    alloc_ref[...] = alloc.astype(alloc_ref.dtype)  # lane-dense stores
    pay_ref[...] = pay.astype(pay_ref.dtype)


@partial(jax.jit, static_argnames=("n_bidders", "hidden", "block_batch"))
def auction_forward(bids, packed, *, n_bidders, hidden, block_batch=1024):
    layout, rows, lanes, bias_col = slab_layout(n_bidders, hidden)
    batch = bids.shape[0]

    tb = min(block_batch, _round_up(batch, 128))    # lane tile, multiple of 128
    pb = _round_up(batch, tb)
    grid = (pl.cdiv(pb, tb),)

    # feature-major: (n_bidders, padded_batch), batch on the lane axis
    bids_t = jnp.pad(bids.astype(jnp.float32).T, ((0, 0), (0, pb - batch)))

    flops = 2 * pb * sum(o * i for (_, o, i) in layout)
    transcendentals = pb * (2 * n_bidders + 1)
    bytes_accessed = 4 * (bids_t.size + 2 * n_bidders * pb + rows * lanes)

    kernel = partial(auction_kernel, layout=layout, n_bidders=n_bidders,
                     bias_col=bias_col)

    alloc_t, pay_t = pl.pallas_call(
        kernel,
        out_shape=(jax.ShapeDtypeStruct((n_bidders, pb), jnp.float32),
                   jax.ShapeDtypeStruct((n_bidders, pb), jnp.float32)),
        grid=grid,
        in_specs=[
            pl.BlockSpec((n_bidders, tb), lambda i: (0, i)),   # bids tile
            pl.BlockSpec((rows, lanes), lambda i: (0, 0)),     # resident params
        ],
        out_specs=(
            pl.BlockSpec((n_bidders, tb), lambda i: (0, i)),
            pl.BlockSpec((n_bidders, tb), lambda i: (0, i)),
        ),
        compiler_params=pltpu.CompilerParams(
            dimension_semantics=("parallel",)),
        cost_estimate=pl.CostEstimate(flops=flops,
                                      transcendentals=transcendentals,
                                      bytes_accessed=bytes_accessed),
    )(bids_t, packed)

    alloc = alloc_t[:, :batch].T.astype(bids.dtype)
    pay = pay_t[:, :batch].T.astype(bids.dtype)
    return alloc, pay


def reference_forward(bids, params, n_bidders, hidden):
    nl = len(hidden)
    z = bids
    for i in range(nl):
        w, b = params[2 * i], params[2 * i + 1]
        z = jnp.maximum(z @ w.T + b, 0.0)
    wa, ba = params[2 * nl], params[2 * nl + 1]
    wp, bp = params[2 * nl + 2], params[2 * nl + 3]
    alloc = jax.nn.softmax(z @ wa.T + ba, axis=1)
    frac = jax.nn.sigmoid(z @ wp.T + bp)
    pay = frac * bids * alloc
    return alloc, pay


if __name__ == "__main__":
    key = jax.random.PRNGKey(0)
    k_param, k_bids = jax.random.split(key)

    n_bidders = 4
    hidden = (64, 32, 16)
    batch = 1024

    params = make_params(k_param, n_bidders, hidden)
    packed = pack_params(params, n_bidders, hidden)
    bids = jax.random.uniform(k_bids, (batch, n_bidders), jnp.float32, 0.0, 1.0)

    alloc, pay = auction_forward(bids, packed, n_bidders=n_bidders,
                                 hidden=hidden, block_batch=512)
    jax.block_until_ready((alloc, pay))

    # sanity check against pure-JAX reference (tolerance loosened slightly for
    # the approximate EUP reciprocal in the softmax denominator)
    ref_alloc, ref_pay = reference_forward(bids, params, n_bidders, hidden)
    assert jnp.allclose(alloc, ref_alloc, rtol=5e-3, atol=5e-3), "alloc mismatch"
    assert jnp.allclose(pay, ref_pay, rtol=5e-3, atol=5e-3), "pay mismatch"
    assert jnp.allclose(jnp.sum(alloc, axis=1), 1.0, atol=5e-3), "alloc rows must sum to 1"

    print("KERNEL_OK")
</pallas_src>

<mosaic_0001>
module attributes {stable_mosaic.version = 11 : i64} {
  func.func @auction_kernel(%arg0: i32, %arg1: memref<4x512xf32, #tpu.memory_space<vmem>>, %arg2: memref<120x128xf32, #tpu.memory_space<vmem>>, %arg3: memref<4x512xf32, #tpu.memory_space<vmem>>, %arg4: memref<4x512xf32, #tpu.memory_space<vmem>>) attributes {dimension_semantics = [#tpu.dimension_semantics<parallel>], iteration_bounds = array<i64: 2>, scalar_prefetch = 0 : i64, scratch_operands = 0 : i64, tpu.core_type = #tpu.core_type<tc>, window_params = [{transform_indices = @transform_0, window_bounds = array<i64: 4, 512>}, {pipeline_mode = #tpu.pipeline_mode<synchronous>, transform_indices = @transform_1, window_bounds = array<i64: 120, 128>}, {transform_indices = @transform_2, window_bounds = array<i64: 4, 512>}, {transform_indices = @transform_3, window_bounds = array<i64: 4, 512>}]} {
    %c0 = arith.constant 0 : index
    %c0_0 = arith.constant 0 : index
    %0 = vector.load %arg1[%c0, %c0_0] : memref<4x512xf32, #tpu.memory_space<vmem>>, vector<4x512xf32>
    %c0_1 = arith.constant 0 : index
    %c0_2 = arith.constant 0 : index
    %1 = vector.load %arg2[%c0_1, %c0_2] : memref<120x128xf32, #tpu.memory_space<vmem>>, vector<64x4xf32>
    %c0_3 = arith.constant 0 : index
    %c127 = arith.constant 127 : index
    %2 = vector.load %arg2[%c0_3, %c127] : memref<120x128xf32, #tpu.memory_space<vmem>>, vector<64x1xf32>
    %cst = arith.constant dense<0.000000e+00> : vector<64x512xf32>
    %3 = tpu.matmul %1, %0, %cst {dimension_numbers = #tpu.dot_dimension_numbers<[1], [0], [0], [1], [0, 0, 1, 1], [], []>} : vector<64x4xf32>, vector<4x512xf32>, vector<64x512xf32> -> vector<64x512xf32>
    %4 = vector.broadcast %2 : vector<64x1xf32> to vector<64x512xf32>
    %5 = arith.addf %3, %4 : vector<64x512xf32>
    %cst_4 = arith.constant 0.000000e+00 : f32
    %6 = vector.broadcast %cst_4 : f32 to vector<64x512xf32>
    %7 = arith.maximumf %5, %6 : vector<64x512xf32>
    %c64 = arith.constant 64 : index
    %c0_5 = arith.constant 0 : index
    %8 = vector.load %arg2[%c64, %c0_5] : memref<120x128xf32, #tpu.memory_space<vmem>>, vector<32x64xf32>
    %c64_6 = arith.constant 64 : index
    %c127_7 = arith.constant 127 : index
    %9 = vector.load %arg2[%c64_6, %c127_7] : memref<120x128xf32, #tpu.memory_space<vmem>>, vector<32x1xf32>
    %cst_8 = arith.constant dense<0.000000e+00> : vector<32x512xf32>
    %10 = tpu.matmul %8, %7, %cst_8 {dimension_numbers = #tpu.dot_dimension_numbers<[1], [0], [0], [1], [0, 0, 1, 1], [], []>} : vector<32x64xf32>, vector<64x512xf32>, vector<32x512xf32> -> vector<32x512xf32>
    %11 = vector.broadcast %9 : vector<32x1xf32> to vector<32x512xf32>
    %12 = arith.addf %10, %11 : vector<32x512xf32>
    %cst_9 = arith.constant 0.000000e+00 : f32
    %13 = vector.broadcast %cst_9 : f32 to vector<32x512xf32>
    %14 = arith.maximumf %12, %13 : vector<32x512xf32>
    %c96 = arith.constant 96 : index
    %c0_10 = arith.constant 0 : index
    %15 = vector.load %arg2[%c96, %c0_10] : memref<120x128xf32, #tpu.memory_space<vmem>>, vector<16x32xf32>
    %c96_11 = arith.constant 96 : index
    %c127_12 = arith.constant 127 : index
    %16 = vector.load %arg2[%c96_11, %c127_12] : memref<120x128xf32, #tpu.memory_space<vmem>>, vector<16x1xf32>
    %cst_13 = arith.constant dense<0.000000e+00> : vector<16x512xf32>
    %17 = tpu.matmul %15, %14, %cst_13 {dimension_numbers = #tpu.dot_dimension_numbers<[1], [0], [0], [1], [0, 0, 1, 1], [], []>} : vector<16x32xf32>, vector<32x512xf32>, vector<16x512xf32> -> vector<16x512xf32>
    %18 = vector.broadcast %16 : vector<16x1xf32> to vector<16x512xf32>
    %19 = arith.addf %17, %18 : vector<16x512xf32>
    %cst_14 = arith.constant 0.000000e+00 : f32
    %20 = vector.broadcast %cst_14 : f32 to vector<16x512xf32>
    %21 = arith.maximumf %19, %20 : vector<16x512xf32>
    %c112 = arith.constant 112 : index
    %c0_15 = arith.constant 0 : index
    %22 = vector.load %arg2[%c112, %c0_15] : memref<120x128xf32, #tpu.memory_space<vmem>>, vector<8x16xf32>
    %c112_16 = arith.constant 112 : index
    %c127_17 = arith.constant 127 : index
    %23 = vector.load %arg2[%c112_16, %c127_17] : memref<120x128xf32, #tpu.memory_space<vmem>>, vector<8x1xf32>
    %cst_18 = arith.constant dense<0.000000e+00> : vector<8x512xf32>
    %24 = tpu.matmul %22, %21, %cst_18 {dimension_numbers = #tpu.dot_dimension_numbers<[1], [0], [0], [1], [0, 0, 1, 1], [], []>} : vector<8x16xf32>, vector<16x512xf32>, vector<8x512xf32> -> vector<8x512xf32>
    %25 = vector.broadcast %23 : vector<8x1xf32> to vector<8x512xf32>
    %26 = arith.addf %24, %25 : vector<8x512xf32>
    %27 = vector.extract_strided_slice %26 {offsets = [0, 0], sizes = [4, 512], strides = [1, 1]} : vector<8x512xf32> to vector<4x512xf32>
    %28 = vector.extract_strided_slice %26 {offsets = [4, 0], sizes = [4, 512], strides = [1, 1]} : vector<8x512xf32> to vector<4x512xf32>
    %cst_19 = arith.constant dense<0xFF800000> : vector<512xf32>
    %29 = vector.multi_reduction <maximumf>, %27, %cst_19 [0] : vector<4x512xf32> to vector<512xf32>
    %30 = vector.shape_cast %29 : vector<512xf32> to vector<1x512xf32>
    %31 = vector.broadcast %30 : vector<1x512xf32> to vector<4x512xf32>
    %32 = arith.subf %27, %31 : vector<4x512xf32>
    %33 = math.exp %32 : vector<4x512xf32>
    %cst_20 = arith.constant dense<0.000000e+00> : vector<512xf32>
    %34 = vector.multi_reduction <add>, %33, %cst_20 [0] : vector<4x512xf32> to vector<512xf32>
    %35 = vector.shape_cast %34 : vector<512xf32> to vector<1x512xf32>
    %36 = tpu.reciprocal %35 {approx = true} : vector<1x512xf32> -> vector<1x512xf32>
    %37 = vector.broadcast %36 : vector<1x512xf32> to vector<4x512xf32>
    %38 = arith.mulf %33, %37 : vector<4x512xf32>
    %39 = arith.negf %28 : vector<4x512xf32>
    %40 = math.exp %39 : vector<4x512xf32>
    %cst_21 = arith.constant 1.000000e+00 : f32
    %41 = vector.broadcast %cst_21 : f32 to vector<4x512xf32>
    %42 = arith.addf %41, %40 : vector<4x512xf32>
    %43 = arith.divf %41, %42 : vector<4x512xf32>
    %44 = arith.mulf %43, %0 : vector<4x512xf32>
    %45 = arith.mulf %44, %38 : vector<4x512xf32>
    %c0_22 = arith.constant 0 : index
    %c0_23 = arith.constant 0 : index
    %46 = vector.load %arg3[%c0_22, %c0_23] : memref<4x512xf32, #tpu.memory_space<vmem>>, vector<4x512xf32>
    tpu.vector_store %arg3[%c0_22, %c0_23], %38 {strides = array<i32>} : memref<4x512xf32, #tpu.memory_space<vmem>>, vector<4x512xf32>,
    %c0_24 = arith.constant 0 : index
    %c0_25 = arith.constant 0 : index
    %47 = vector.load %arg4[%c0_24, %c0_25] : memref<4x512xf32, #tpu.memory_space<vmem>>, vector<4x512xf32>
    tpu.vector_store %arg4[%c0_24, %c0_25], %45 {strides = array<i32>} : memref<4x512xf32, #tpu.memory_space<vmem>>, vector<4x512xf32>,
    return
  }
  func.func @transform_0(%arg0: i32) -> (i32, i32) {
    %c0_i32 = arith.constant 0 : i32
    %c0_i32_0 = arith.constant 0 : i32
    return %c0_i32, %arg0 : i32, i32
  }
  func.func @transform_1(%arg0: i32) -> (i32, i32) {
    %c0_i32 = arith.constant 0 : i32
    %c0_i32_0 = arith.constant 0 : i32
    %c0_i32_1 = arith.constant 0 : i32
    return %c0_i32, %c0_i32_0 : i32, i32
  }
  func.func @transform_2(%arg0: i32) -> (i32, i32) {
    %c0_i32 = arith.constant 0 : i32
    %c0_i32_0 = arith.constant 0 : i32
    return %c0_i32, %arg0 : i32, i32
  }
  func.func @transform_3(%arg0: i32) -> (i32, i32) {
    %c0_i32 = arith.constant 0 : i32
    %c0_i32_0 = arith.constant 0 : i32
    return %c0_i32, %arg0 : i32, i32
  }
}

</mosaic_0001>

<bundles_post_ra>
// kernel: auction_forward.1
= control target key start
LH: loop header
LB: loop body
LE: loop exit
PB: predicated region body
PF: predicated region fallthrough
CT: control target
= control target key end

     0   :  { %9 = vsyncpa [#allocation3], 0  ;;  %s2158_s0 = inlined_call_operand.hbm [shape: f32[4,1024], index: 0, kind: input, shape index: {}]   ;;  %s2159_s1 = inlined_call_operand.hbm [shape: f32[120,128], index: 1, kind: input, shape index: {}]   ;;  %s2160_s2 = inlined_call_operand.hbm [shape: f32[4,1024], index: 2, kind: output, shape index: {0}]   ;;  %s2161_s3 = inlined_call_operand.hbm [shape: f32[4,1024], index: 3, kind: output, shape index: {1}]  }
   0x1   :  { %11 = vsyncpa [#allocation3 + $0x1], 0 }
   0x2   :  { %12 = vsyncpa [#allocation6], 0 }
   0x3   :  { %13 = vsyncpa [#allocation4], 0 }
   0x4   :  { %15 = vsyncpa [#allocation4 + $0x1], 0 }
   0x5   :  { %16 = vsyncpa [#allocation9], 0 }
   0x6   :  { %18 = vsyncpa [#allocation9 + $0x1], 0  ;;  %s1808_s12 = smov 0   ;;  %s1810_s13 = smov 0  }
   0x7   :  { %s1812_s14 = smov 0   ;;  %s1814_s15 = smov 0  }
   0x8 LB: > { %s1829_s16 = sadd.s32 4294967295, %s1778_s15   ;;  %s1397_s17 = sadd.s32 4294967294, %s1778_s15   ;;  %s1778_s15 = sphi %s1814_s15, %s2181_s15   ;;  %s1774_s14 = sphi %s1812_s14, %s2180_s14   ;;  %s1770_s13 = sphi %s1810_s13, %s2179_s13   ;;  %s1766_s12 = sphi %s1808_s12, %s2178_s12  }
   0x9   : > { %p44_p0 = scmp.ne.s32.totalorder %s1770_s13, %s1766_s12  ;;  %p2162_p1 = scmp.eq.s32.totalorder %s1829_s16, 0 }
   0xa   : > { %p95_p3 = scmp.eq.s32.totalorder %s1397_s17, 1  ;;  %p1398_p5 = scmp.ge.s32.totalorder %s1778_s15, 1 }
   0xb   : > { %p1838_p4 = por %p2162_p1, %p44_p0  ;;  %p128_p7 = scmp.lt.s32.totalorder %s1778_s15, 3 }
   0xc   : > { %p1843_p6 = por %p95_p3, %p44_p0  ;;  %s1780_s21 = smov [#allocation5]  }
   0xd   : > { %s2165_s18 = scalar_select %p1838_p4, 1, 0 }
   0xe   : > { %s2166_s19 = scalar_select %p1843_p6, 1, 0 }
   0xf   : > { %p1848_p8 = pnand %p1398_p5, %p128_p7  ;;  %s140_s22 = sshll.u32 %s1780_s21, 4  ;;  %s1852_s22 = int_to_ptr.vmem [resolvable:$true] %s140_s22 }
  0x10   : > { %s1864_s24 = sadd.s32 1, %s1778_s15   ;;  %s31_s25 = sadd.s32 1, %s1774_s14 }
  0x11   : > { %s2167_s20 = scalar_select %p1848_p8, 1, 0 }
  0x12   : > { %p1524_p9 = pneg %p1848_p8  ;;  %s28_s26 = ssub.s32 %s1778_s15, %s1864_s24 }
  0x13   : > { %s1618_s29 = scalar_lea.hbm %s2159_s1, 1920 }
  0x14   : > { %p1859_p11 = pnand %p1524_p9, %p2162_p1  ;;  %p1619_p12 = scmp.ne.s32.totalorder %s2159_s1, %s1618_s29 }
  0x15   : > { %p1625_p5 = scmp.lt.u32.totalorder %s1618_s29, %s2159_s1 }
  0x16   : > { %p1620_p13 = pneg %p1859_p11 }
  0x18   : > { %p1621_p0 = pnand %p1620_p13, %p1619_p12 }
  0x1a   : > { %p1622_p3 = pneg %p1621_p0 }
  0x1c   : > { %p1627_p7 = pnand %p1625_p5, %p1622_p3 }
  0x1e   : > { %1630 = shalt.err (!%p1627_p7)
}
  0x1f   : > { %s1631_s7 = scalar_lea.vmem %s1852_s22, 1920  ;;  %p1639_p2 = scmp.lt.s32.totalorder %s1852_s22, %s1852_s22 }
  0x20   : > { %p1632_p9 = scmp.ne.s32.totalorder %s1852_s22, %s1631_s7  ;;  %p1640_p6 = scmp.lt.s32.totalorder %s1631_s7, %s1631_s7 }
  0x22   : > { %p1634_p10 = pnand %p1632_p9, %p1620_p13  ;;  %p1641_p4 = por %p1640_p6, %p1639_p2 }
  0x24   : > { %p1635_p1 = pneg %p1634_p10 }
  0x26   : > { %p1642_p8 = pnand %p1641_p4, %p1635_p1 }
  0x28   : > { %1645 = shalt.err (!%p1642_p8)
}
  0x29   : > { %s1781_s8 = smov 128   ;;  %s1782_s9 = smov 8  }
  0x2a   : > { %1527 = dma.hbm_to_vmem [thread:$0]  (!%p1859_p11), %s2159_s1, 1920, %s1852_s22, [#allocation6], %s1781_s8, %s1781_s8, %s1782_s9  }
  0x2b   : > { %p29_p2 = scmp.eq.s32.totalorder %s28_s26, 0  ;;  %p38_p1 = scmp.ne.s32.totalorder %s1774_s14, %s1770_s13 }
  0x2c   : > { %p39_p4 = scmp.eq.s32.totalorder %s1778_s15, 0  ;;  %p1540_p6 = scmp.lt.s32.totalorder %s1778_s15, 2 }
  0x2d   : > { %s1895_s17 = scalar_select %p29_p2, %s1774_s14, %s31_s25  }
  0x2e   : > { %p40_p8 = por %p39_p4, %p38_p1  ;;  %p2169_p10 = scmp.eq.s32.totalorder %s1829_s16, 1 }
  0x2f   : > { %s154_s27 = sand.u32 1, %s1774_s14   ;;  %s1455_s28 = sshll.u32 %s1778_s15, 8 }
  0x30   : > { %p1899_p12 = por %p2169_p10, %p38_p1  ;;  %s1401_s29 = sshll.u32 %s154_s27, 4 }
  0x31   : > { %s1908_s4 = scalar_lea.hbm %s2158_s0, %s1455_s28  ;;  %s158_s22 = scalar_lea.vmem [#allocation2], %s1401_s29 }
  0x32   : > { %s166_s25 = sshll.u32 %s158_s22, 4  ;;  %p1910_p11 = pnand %p1540_p6, %p40_p8  ;;  %s1914_s25 = int_to_ptr.vmem [resolvable:$true] %s166_s25 }
  0x33   : > { %s155_s5 = scalar_lea.sflag [#allocation3], %s154_s27  ;;  %s1646_s6 = scalar_lea.hbm %s1908_s4, 256 }
  0x34   : > { %p1647_p13 = scmp.ne.s32.totalorder %s1908_s4, %s1646_s6  ;;  %p1648_p0 = pneg %p1910_p11 }
  0x35   : > { %s1651_s9 = scalar_lea.hbm %s2158_s0, 512  ;;  %p1652_p7 = scmp.lt.u32.totalorder %s1908_s4, %s2158_s0 }
  0x36   : > { %p1649_p3 = pnand %p1648_p0, %p1647_p13  ;;  %p1653_p9 = scmp.lt.u32.totalorder %s1651_s9, %s1646_s6 }
  0x37   : > { %p1655_p1 = scmp.lt.u32.totalorder %s1646_s6, %s1908_s4 }
  0x38   : > { %p1650_p5 = pneg %p1649_p3  ;;  %p1654_p2 = por %p1653_p9, %p1652_p7 }
  0x3a   : > { %p1656_p4 = por %p1655_p1, %p1654_p2 }
  0x3c   : > { %p1657_p6 = pnand %p1656_p4, %p1650_p5 }
  0x3e   : > { %1660 = shalt.err (!%p1657_p6)
}
  0x3f   : > { %s1661_s27 = scalar_lea.vmem %s1914_s25, 256  ;;  %s1783_s28 = smov [#allocation2]  }
  0x40   : > { %p1662_p8 = scmp.ne.s32.totalorder %s1914_s25, %s1661_s27  ;;  %s1666_s29 = sshll.u32 %s1783_s28, 4  ;;  %s1667_s29 = int_to_ptr.vmem [resolvable:$false] %s1666_s29 }
  0x41   : > { %s1668_s23 = scalar_lea.vmem %s1667_s29, 512  ;;  %p1669_p3 = scmp.lt.s32.totalorder %s1914_s25, %s1667_s29 }
  0x42   : > { %p1664_p10 = pnand %p1662_p8, %p1648_p0  ;;  %p1670_p7 = scmp.lt.s32.totalorder %s1668_s23, %s1661_s27 }
  0x44   : > { %p1665_p13 = pneg %p1664_p10  ;;  %p1671_p9 = por %p1670_p7, %p1669_p3 }
  0x46   : > { %p1672_p2 = pnand %p1671_p9, %p1665_p13 }
  0x48   : > { %1675 = shalt.err (!%p1672_p2)
}
  0x49   : > { %1531 = dma.hbm_to_vmem [thread:$0]  (!%p1910_p11), %s1908_s4, 256, %s1914_s25, %s155_s5  }
  0x4a   : > { %p2172_p5 = scmp.ne.s32.totalorder %s2167_s20, 0 }
  0x4b   : > { %s1944_s30 = sand.u32 (!%p2172_p5), 1, %s1770_s13   ;;  %p2173_p0 = scmp.ne.s32.totalorder (!%p2172_p5), %s2165_s18, 0 }
  0x4c   : > { %175 = sbr.rel (%p2172_p5) target bundleno = 1117 (0x45d), region = 28  ;;  %s1947_s22 = sshll.u32 (!%p2172_p5), %s1944_s30, 4 }
  0x4d   : > { %s178_s6 = scalar_lea.sflag (!%p2172_p5), [#allocation3], %s1944_s30  ;;  %s181_s7 = scalar_lea.vmem (!%p2172_p5), [#allocation2], %s1947_s22 }
  0x53   : > { %1749 = dma.done.wait (%p2173_p0), %s178_s6, 256  }
  0x54   : > { %1751 = vsyncadd (%p2173_p0), %s178_s6, 4294967040  ;;  %p2174_p11 = scmp.eq.s32.totalorder %s1829_s16, 0 }
  0x56   : > { %1753 = dma.done.wait (%p2174_p11), [#allocation6], 1920   ;;  %p2175_p1 = pmov %p2174_p11 }
  0x57   : > { %v1784_v0 = vmov 0.0   ;;  %v1785_v1 = vmov 127   ;;  %v1961_v2 = vld [vmem:[%s181_s7] sm:$0xff]  ;;  %vm287_vm0 = vcmask 1043456   ;;  %v1963_v3 = vld [vmem:[%s181_s7 + $0x8] sm:$0xff]  ;;  %vm270_vm1 = vcmask 31744  }
  0x58   : > { %1755 = vsyncadd (%p2175_p1), [#allocation6], 4294965376  ;;  %360 = vmatprep.mubr.f32.mxu0 %v1784_v0  ;;  %473 = vmatprep.mubr.f32.mxu1 %v1784_v0  ;;  %v218_v4 = vld [vmem:[#allocation5] sm:$0xff]  ;;  %v268_v5 = vcombine.high %v1961_v2, %v1961_v2  ;;  %v269_v6 = vcombine.high %v1963_v3, %v1963_v3  ;;  %v220_v7 = vld [vmem:[#allocation5 + $0x10] sm:$0xff]  ;;  %vm578_vm2 = vcmask 523264   ;;  %vm793_vm3 = vcmask 261120  }
  0x59   : > { %1580 = vset.pattern.permute.xlu0 %v1785_v1  ;;  %1581 = vset.pattern.permute.xlu1 %v1785_v1  ;;  %v219_v8 = vld [vmem:[#allocation5 + $0x8] sm:$0xff]  ;;  %v221_v9 = vld [vmem:[#allocation5 + $0x18] sm:$0xff]  ;;  %v222_v10 = vld [vmem:[#allocation5 + $0x20] sm:$0xff]  ;;  %vm966_vm4 = vcmask 130048   ;;  %s1456_s18 = sshll.u32 %s1829_s16, 8  ;;  %s205_s20 = scalar_lea.vmem [#allocation7], %s1947_s22 }
  0x5a   : > { %228 = vperm.xlu0 %1580, %v218_v4   ;;  %238 = vperm.xlu1 %1581, %v220_v7   ;;  %v223_v11 = vld [vmem:[#allocation5 + $0x28] sm:$0xff]  ;;  %v224_v12 = vld [vmem:[#allocation5 + $0x30] sm:$0xff]  ;;  %v225_v13 = vld [vmem:[#allocation5 + $0x38] sm:$0xff]  ;;  %s1271_s4 = sshll.u32 %s205_s20, 4  ;;  %s2075_s5 = scalar_lea.hbm %s2160_s2, %s1456_s18  ;;  %s2077_s4 = int_to_ptr.vmem [resolvable:$true] %s1271_s4 }
  0x5b   : > { %1409 = vmatprep.subr.msk.mxu0 %vm287_vm0, %v268_v5  ;;  %1419 = vmatprep.subr.msk.mxu1 %vm287_vm0, %v269_v6  ;;  %v1987_v14 = vld [vmem:[#allocation5 + $0x40] sm:$0xff]  ;;  %v1989_v15 = vld [vmem:[#allocation5 + $0x48] sm:$0xff]  ;;  %v1997_v16 = vld [vmem:[#allocation5 + $0x50] sm:$0xff]  ;;  %s2080_s8 = scalar_lea.vmem [#allocation8], %s1947_s22  ;;  %s1252_s10 = scalar_lea.sflag [#allocation4], %s1944_s30 }
  0x5c   : > { %1410 = vmatpush1.msk.msra.mxu0 %vm287_vm0, %v1961_v2  ;;  %1420 = vmatpush1.msk.msra.mxu1 %vm287_vm0, %v1963_v3  ;;  %v1999_v17 = vld [vmem:[#allocation5 + $0x58] sm:$0xff]  ;;  %v2007_v18 = vld [vmem:[#allocation5 + $0x60] sm:$0xff]  ;;  %v2009_v19 = vld [vmem:[#allocation5 + $0x68] sm:$0xff]  ;;  %s1285_s9 = sshll.u32 %s2080_s8, 4  ;;  %s1676_s11 = scalar_lea.vmem %s2077_s4, 256  ;;  %s2115_s9 = int_to_ptr.vmem [resolvable:$true] %s1285_s9 }
  0x5d   : > { %1411 = vmatmul.mubr.msk.f32.vlgmr.msra.gmra.mrb[0].mxu0 %vm270_vm1, %v218_v4  ;;  %1421 = vmatmul.mubr.msk.f32.vlgmr.msra.gmra.mrb[0].mxu1 %vm270_vm1, %v218_v4  ;;  %v2017_v20 = vld [vmem:[#allocation5 + $0x70] sm:$0xff]  ;;  %p1677_p4 = scmp.ne.s32.totalorder %s2077_s4, %s1676_s11  ;;  %s1786_s27 = smov [#allocation7]  }
  0x5e   : > { %366 = vmatprep.mubr.f32.mxu0 %v1784_v0  ;;  %479 = vmatprep.mubr.f32.mxu1 %v1784_v0  ;;  %s1680_s28 = sshll.u32 %s1786_s27, 4  ;;  %s1681_s28 = int_to_ptr.vmem [resolvable:$false] %s1680_s28 }
  0x5f   : > { %233 = vperm.xlu0 %1580, %v219_v8   ;;  %243 = vperm.xlu1 %1581, %v221_v9   ;;  %p1678_p6 = pnand %p1677_p4, %p1899_p12  ;;  %s1682_s29 = scalar_lea.vmem %s1681_s28, 512 }
  0x60   : > { %p1683_p10 = scmp.lt.s32.totalorder %s2077_s4, %s1681_s28  ;;  %p1684_p13 = scmp.lt.s32.totalorder %s1682_s29, %s1676_s11 }
  0x61   : > { %1412 = vmatmul.mubr.msk.f32.gmra.mrb[2].mxu0 %vm270_vm1, %v219_v8  ;;  %1422 = vmatmul.mubr.msk.f32.gmra.mrb[2].mxu1 %vm270_vm1, %v219_v8  ;;  %p1679_p8 = pneg %p1678_p6 }
  0x62   : > { %372 = vmatprep.mubr.f32.mxu0 %v1784_v0  ;;  %485 = vmatprep.mubr.f32.mxu1 %v1784_v0  ;;  %p1685_p3 = por %p1684_p13, %p1683_p10 }
  0x63   : > { %248 = vperm.xlu0 %1580, %v222_v10   ;;  %253 = vperm.xlu1 %1581, %v223_v11  }
  0x64   : > { %p1686_p7 = pnand %p1685_p3, %p1679_p8 }
  0x65   : > { %1413 = vmatmul.mubr.msk.f32.gmra.mrb[4].mxu0 %vm270_vm1, %v220_v7  ;;  %1423 = vmatmul.mubr.msk.f32.gmra.mrb[4].mxu1 %vm270_vm1, %v220_v7 }
  0x66   : > { %378 = vmatprep.mubr.f32.mxu0 %v1784_v0  ;;  %491 = vmatprep.mubr.f32.mxu1 %v1784_v0 }
  0x67   : > { %258 = vperm.xlu0 %1580, %v224_v12   ;;  %263 = vperm.xlu1 %1581, %v225_v13  }
  0x69   : > { %1414 = vmatmul.mubr.msk.f32.gmra.mrb[6].mxu0 %vm270_vm1, %v221_v9  ;;  %1424 = vmatmul.mubr.msk.f32.gmra.mrb[6].mxu1 %vm270_vm1, %v221_v9 }
  0x6a   : > { %384 = vmatprep.mubr.f32.mxu0 %v1784_v0  ;;  %497 = vmatprep.mubr.f32.mxu1 %v1784_v0 }
  0x6b   : > { %560 = vperm.xlu0 %1580, %v1987_v14   ;;  %565 = vperm.xlu1 %1581, %v1989_v15  }
  0x6d   : > { %1415 = vmatmul.mubr.msk.f32.gmra.mrb[8].mxu0 %vm270_vm1, %v222_v10  ;;  %1425 = vmatmul.mubr.msk.f32.gmra.mrb[8].mxu1 %vm270_vm1, %v222_v10 }
  0x6e   : > { %390 = vmatprep.mubr.f32.mxu0 %v1784_v0  ;;  %503 = vmatprep.mubr.f32.mxu1 %v1784_v0 }
  0x6f   : > { %570 = vperm.xlu0 %1580, %v1997_v16   ;;  %575 = vperm.xlu1 %1581, %v1999_v17  }
  0x71   : > { %1416 = vmatmul.mubr.msk.f32.gmra.mrb[10].mxu0 %vm270_vm1, %v223_v11  ;;  %1426 = vmatmul.mubr.msk.f32.gmra.mrb[10].mxu1 %vm270_vm1, %v223_v11 }
  0x72   : > { %396 = vmatprep.mubr.f32.mxu0 %v1784_v0  ;;  %509 = vmatprep.mubr.f32.mxu1 %v1784_v0 }
  0x73   : > { %785 = vperm.xlu0 %1580, %v2007_v18   ;;  %790 = vperm.xlu1 %1581, %v2009_v19  }
  0x75   : > { %1417 = vmatmul.mubr.msk.f32.gmra.mrb[12].mxu0 %vm270_vm1, %v224_v12  ;;  %1427 = vmatmul.mubr.msk.f32.gmra.mrb[12].mxu1 %vm270_vm1, %v224_v12 }
  0x76   : > { %402 = vmatprep.mubr.f32.mxu0 %v1784_v0  ;;  %515 = vmatprep.mubr.f32.mxu1 %v1784_v0 }
  0x77   : > { %963 = vperm.xlu0 %1580, %v2017_v20  }
  0x79   : > { %1418 = vmatmul.mubr.msk.f32.gmra.mrb[14].mxu0 %vm270_vm1, %v225_v13  ;;  %1428 = vmatmul.mubr.msk.f32.gmra.mrb[14].mxu1 %vm270_vm1, %v225_v13 }
  0x7a   : > { %651 = vmatprep.mubr.f32.mxu0 %v1784_v0  ;;  %740 = vmatprep.mubr.f32.mxu1 %v1784_v0 }
  0xd9   : > { %v229_v21 = vpop.permute.xlu0 %228  ;;  %v239_v27 = vpop.permute.xlu1 %238 }
  0xde   : > { %v234_v26 = vpop.permute.xlu0 %233  ;;  %v244_v56 = vpop.permute.xlu1 %243 }
 0x130   : > { %v362_v22 = vpop.f32.mrb[0].mxu0  ;;  %v475_v23 = vpop.f32.mrb[0].mxu1 }
 0x131   : > { %v364_v24 = vpop.f32.mrb[1].mxu0  ;;  %v477_v25 = vpop.f32.mrb[1].mxu1  ;;  %v363_v28 = vadd.f32 %v362_v22, %v229_v21  ;;  %v476_v29 = vadd.f32 %v475_v23, %v229_v21 }
 0x132   : > { %v365_v30 = vadd.f32 %v364_v24, %v229_v21  ;;  %v478_v31 = vadd.f32 %v477_v25, %v229_v21 }
 0x133   : > { %v522_v40 = vmax.f32 %v363_v28, 0.0  ;;  %v524_v41 = vmax.f32 %v476_v29, 0.0  ;;  %v249_v29 = vpop.permute.xlu0 %248 }
 0x134   : > { %v368_v32 = vpop.f32.mrb[2].mxu0  ;;  %v481_v33 = vpop.f32.mrb[2].mxu1  ;;  %v523_v44 = vmax.f32 %v365_v30, 0.0  ;;  %v525_v45 = vmax.f32 %v478_v31, 0.0 }
 0x135   : > { %v369_v34 = vadd.f32 %v368_v32, %v234_v26  ;;  %v482_v35 = vadd.f32 %v481_v33, %v234_v26  ;;  %v370_v36 = vpop.f32.mrb[3].mxu0  ;;  %v483_v37 = vpop.f32.mrb[3].mxu1 }
 0x136   : > { %v371_v38 = vadd.f32 %v370_v36, %v234_v26  ;;  %v484_v39 = vadd.f32 %v483_v37, %v234_v26  ;;  %v254_v32 = vpop.permute.xlu1 %253 }
 0x137   : > { %v526_v42 = vmax.f32 %v369_v34, 0.0  ;;  %v528_v43 = vmax.f32 %v482_v35, 0.0 }
 0x138   : > { %v527_v46 = vmax.f32 %v371_v38, 0.0  ;;  %v529_v47 = vmax.f32 %v484_v39, 0.0  ;;  %v374_v48 = vpop.f32.mrb[4].mxu0  ;;  %v487_v49 = vpop.f32.mrb[4].mxu1 }
 0x139   : > { %v1460_v50 = vpack.c.bf16 %v526_v42, %v522_v40  ;;  %v1476_v51 = vpack.c.bf16 %v528_v43, %v524_v41  ;;  %v376_v52 = vpop.f32.mrb[5].mxu0  ;;  %v489_v53 = vpop.f32.mrb[5].mxu1  ;;  %v375_v57 = vadd.f32 %v374_v48, %v239_v27  ;;  %v488_v58 = vadd.f32 %v487_v49, %v239_v27 }
 0x13a   : > { %v1458_v54 = vpack.c.bf16 %v527_v46, %v523_v44  ;;  %v1474_v55 = vpack.c.bf16 %v529_v47, %v525_v45  ;;  %v377_v59 = vadd.f32 %v376_v52, %v239_v27  ;;  %v490_v60 = vadd.f32 %v489_v53, %v239_v27 }
 0x13b   : > { %v530_v8 = vmax.f32 %v375_v57, 0.0  ;;  %v532_v9 = vmax.f32 %v488_v58, 0.0 }
 0x13c   : > { %v380_v61 = vpop.f32.mrb[6].mxu0  ;;  %v493_v62 = vpop.f32.mrb[6].mxu1  ;;  %1459 = vmatprep.subr.bf16.mxu0 %v1458_v54  ;;  %1475 = vmatprep.subr.bf16.mxu1 %v1474_v55  ;;  %v531_v12 = vmax.f32 %v377_v59, 0.0  ;;  %v533_v13 = vmax.f32 %v490_v60, 0.0 }
 0x13d   : > { %v381_v63 = vadd.f32 %v380_v61, %v244_v56  ;;  %v494_v1 = vadd.f32 %v493_v62, %v244_v56  ;;  %v382_v4 = vpop.f32.mrb[7].mxu0  ;;  %v495_v5 = vpop.f32.mrb[7].mxu1  ;;  %1461 = vmatpush1.bf16.msra.mxu0 %v1460_v50  ;;  %1477 = vmatpush1.bf16.msra.mxu1 %v1476_v51 }
 0x13e   : > { %v383_v6 = vadd.f32 %v382_v4, %v244_v56  ;;  %v496_v7 = vadd.f32 %v495_v5, %v244_v56  ;;  %v259_v59 = vpop.permute.xlu0 %258  ;;  %v264_v62 = vpop.permute.xlu1 %263 }
 0x13f   : > { %v534_v10 = vmax.f32 %v381_v63, 0.0  ;;  %v536_v11 = vmax.f32 %v494_v1, 0.0 }
 0x140   : > { %v535_v21 = vmax.f32 %v383_v6, 0.0  ;;  %v537_v22 = vmax.f32 %v496_v7, 0.0  ;;  %v386_v23 = vpop.f32.mrb[8].mxu0  ;;  %v499_v24 = vpop.f32.mrb[8].mxu1 }
 0x141   : > { %v1464_v25 = vpack.c.bf16 %v534_v10, %v530_v8  ;;  %v1480_v26 = vpack.c.bf16 %v536_v11, %v532_v9  ;;  %v388_v27 = vpop.f32.mrb[9].mxu0  ;;  %v501_v28 = vpop.f32.mrb[9].mxu1  ;;  %v387_v33 = vadd.f32 %v386_v23, %v249_v29  ;;  %v500_v34 = vadd.f32 %v499_v24, %v249_v29 }
 0x142   : > { %v1462_v30 = vpack.c.bf16 %v535_v21, %v531_v12  ;;  %v1478_v31 = vpack.c.bf16 %v537_v22, %v533_v13  ;;  %v389_v35 = vadd.f32 %v388_v27, %v249_v29  ;;  %v502_v36 = vadd.f32 %v501_v28, %v249_v29 }
 0x143   : > { %v538_v45 = vmax.f32 %v387_v33, 0.0  ;;  %v540_v46 = vmax.f32 %v500_v34, 0.0 }
 0x144   : > { %v392_v37 = vpop.f32.mrb[10].mxu0  ;;  %v505_v38 = vpop.f32.mrb[10].mxu1  ;;  %1463 = vmatprep.subr.bf16.mxu0 %v1462_v30  ;;  %1479 = vmatprep.subr.bf16.mxu1 %v1478_v31  ;;  %v539_v49 = vmax.f32 %v389_v35, 0.0  ;;  %v541_v50 = vmax.f32 %v502_v36, 0.0 }
 0x145   : > { %v393_v39 = vadd.f32 %v392_v37, %v254_v32  ;;  %v506_v40 = vadd.f32 %v505_v38, %v254_v32  ;;  %v394_v41 = vpop.f32.mrb[11].mxu0  ;;  %v507_v42 = vpop.f32.mrb[11].mxu1  ;;  %1465 = vmatpush1.bf16.msra.mxu0 %v1464_v25  ;;  %1481 = vmatpush1.bf16.msra.mxu1 %v1480_v26 }
 0x146   : > { %v395_v43 = vadd.f32 %v394_v41, %v254_v32  ;;  %v508_v44 = vadd.f32 %v507_v42, %v254_v32  ;;  %v561_v35 = vpop.permute.xlu0 %560  ;;  %v566_v36 = vpop.permute.xlu1 %565 }
 0x147   : > { %v542_v47 = vmax.f32 %v393_v39, 0.0  ;;  %v544_v48 = vmax.f32 %v506_v40, 0.0 }
 0x148   : > { %v543_v51 = vmax.f32 %v395_v43, 0.0  ;;  %v545_v52 = vmax.f32 %v508_v44, 0.0  ;;  %v398_v53 = vpop.f32.mrb[12].mxu0  ;;  %v511_v54 = vpop.f32.mrb[12].mxu1 }
 0x149   : > { %v1468_v55 = vpack.c.bf16 %v542_v47, %v538_v45  ;;  %v1484_v56 = vpack.c.bf16 %v544_v48, %v540_v46  ;;  %v400_v57 = vpop.f32.mrb[13].mxu0  ;;  %v513_v58 = vpop.f32.mrb[13].mxu1  ;;  %v399_v63 = vadd.f32 %v398_v53, %v259_v59  ;;  %v512_v1 = vadd.f32 %v511_v54, %v259_v59 }
 0x14a   : > { %v1466_v60 = vpack.c.bf16 %v543_v51, %v539_v49  ;;  %v1482_v61 = vpack.c.bf16 %v545_v52, %v541_v50  ;;  %v401_v4 = vadd.f32 %v400_v57, %v259_v59  ;;  %v514_v5 = vadd.f32 %v513_v58, %v259_v59 }
 0x14b   : > { %v546_v21 = vmax.f32 %v399_v63, 0.0  ;;  %v548_v22 = vmax.f32 %v512_v1, 0.0  ;;  %v576_v1 = vpop.permute.xlu1 %575 }
 0x14c   : > { %v404_v6 = vpop.f32.mrb[14].mxu0  ;;  %v517_v7 = vpop.f32.mrb[14].mxu1  ;;  %1467 = vmatprep.subr.bf16.mxu0 %v1466_v60  ;;  %1483 = vmatprep.subr.bf16.mxu1 %v1482_v61  ;;  %v547_v25 = vmax.f32 %v401_v4, 0.0  ;;  %v549_v26 = vmax.f32 %v514_v5, 0.0 }
 0x14d   : > { %v405_v8 = vadd.f32 %v404_v6, %v264_v62  ;;  %v518_v9 = vadd.f32 %v517_v7, %v264_v62  ;;  %v406_v10 = vpop.f32.mrb[15].mxu0  ;;  %v519_v11 = vpop.f32.mrb[15].mxu1  ;;  %1469 = vmatpush1.bf16.msra.mxu0 %v1468_v55  ;;  %1485 = vmatpush1.bf16.msra.mxu1 %v1484_v56 }
 0x14e   : > { %v407_v12 = vadd.f32 %v406_v10, %v264_v62  ;;  %v520_v13 = vadd.f32 %v519_v11, %v264_v62  ;;  %v571_v61 = vpop.permute.xlu0 %570 }
 0x14f   : > { %v550_v23 = vmax.f32 %v405_v8, 0.0  ;;  %v552_v24 = vmax.f32 %v518_v9, 0.0 }
 0x150   : > { %v551_v27 = vmax.f32 %v407_v12, 0.0  ;;  %v553_v28 = vmax.f32 %v520_v13, 0.0 }
 0x151   : > { %v1472_v29 = vpack.c.bf16 %v550_v23, %v546_v21  ;;  %v1488_v30 = vpack.c.bf16 %v552_v24, %v548_v22 }
 0x152   : > { %v1470_v31 = vpack.c.bf16 %v551_v27, %v547_v25  ;;  %v1486_v32 = vpack.c.bf16 %v553_v28, %v549_v26 }
 0x154   : > { %1471 = vmatprep.subr.bf16.mxu0 %v1470_v31  ;;  %1487 = vmatprep.subr.bf16.mxu1 %v1486_v32 }
 0x155   : > { %1473 = vmatpush1.bf16.msra.mxu0 %v1472_v29  ;;  %1489 = vmatpush1.bf16.msra.mxu1 %v1488_v30 }
 0x158   : > { %1429 = vmatmul.mubr.msk.f32.vlgmr.msra.gmra.mrb[16].mxu0 %vm578_vm2, %v1987_v14  ;;  %1433 = vmatmul.mubr.msk.f32.vlgmr.msra.gmra.mrb[16].mxu1 %vm578_vm2, %v1987_v14 }
 0x159   : > { %657 = vmatprep.mubr.f32.mxu0 %v1784_v0  ;;  %746 = vmatprep.mubr.f32.mxu1 %v1784_v0 }
 0x15c   : > { %1430 = vmatmul.mubr.msk.f32.gmra.mrb[18].mxu0 %vm578_vm2, %v1989_v15  ;;  %1434 = vmatmul.mubr.msk.f32.gmra.mrb[18].mxu1 %vm578_vm2, %v1989_v15 }
 0x15d   : > { %663 = vmatprep.mubr.f32.mxu0 %v1784_v0  ;;  %752 = vmatprep.mubr.f32.mxu1 %v1784_v0 }
 0x160   : > { %1431 = vmatmul.mubr.msk.f32.gmra.mrb[20].mxu0 %vm578_vm2, %v1997_v16  ;;  %1435 = vmatmul.mubr.msk.f32.gmra.mrb[20].mxu1 %vm578_vm2, %v1997_v16 }
 0x161   : > { %669 = vmatprep.mubr.f32.mxu0 %v1784_v0  ;;  %758 = vmatprep.mubr.f32.mxu1 %v1784_v0 }
 0x164   : > { %1432 = vmatmul.mubr.msk.f32.gmra.mrb[22].mxu0 %vm578_vm2, %v1999_v17  ;;  %1436 = vmatmul.mubr.msk.f32.gmra.mrb[22].mxu1 %vm578_vm2, %v1999_v17 }
 0x165   : > { %862 = vmatprep.mubr.f32.mxu0 %v1784_v0  ;;  %939 = vmatprep.mubr.f32.mxu1 %v1784_v0 }
 0x22b   : > { %v653_v14 = vpop.f32.mrb[16].mxu0  ;;  %v742_v15 = vpop.f32.mrb[16].mxu1 }
 0x22c   : > { %v655_v33 = vpop.f32.mrb[17].mxu0  ;;  %v744_v34 = vpop.f32.mrb[17].mxu1  ;;  %v654_v37 = vadd.f32 %v653_v14, %v561_v35  ;;  %v743_v16 = vadd.f32 %v742_v15, %v561_v35 }
 0x22d   : > { %v656_v38 = vadd.f32 %v655_v33, %v561_v35  ;;  %v745_v39 = vadd.f32 %v744_v34, %v561_v35 }
 0x22e   : > { %v765_v47 = vmax.f32 %v654_v37, 0.0  ;;  %v767_v48 = vmax.f32 %v743_v16, 0.0  ;;  %v786_v37 = vpop.permute.xlu0 %785  ;;  %v791_v16 = vpop.permute.xlu1 %790 }
 0x22f   : > { %v659_v40 = vpop.f32.mrb[18].mxu0  ;;  %v748_v41 = vpop.f32.mrb[18].mxu1  ;;  %v766_v51 = vmax.f32 %v656_v38, 0.0  ;;  %v768_v52 = vmax.f32 %v745_v39, 0.0 }
 0x230   : > { %v660_v42 = vadd.f32 %v659_v40, %v566_v36  ;;  %v749_v43 = vadd.f32 %v748_v41, %v566_v36  ;;  %v661_v44 = vpop.f32.mrb[19].mxu0  ;;  %v750_v17 = vpop.f32.mrb[19].mxu1 }
 0x231   : > { %v662_v45 = vadd.f32 %v661_v44, %v566_v36  ;;  %v751_v46 = vadd.f32 %v750_v17, %v566_v36 }
 0x232   : > { %v769_v49 = vmax.f32 %v660_v42, 0.0  ;;  %v771_v50 = vmax.f32 %v749_v43, 0.0 }
 0x233   : > { %v770_v53 = vmax.f32 %v662_v45, 0.0  ;;  %v772_v54 = vmax.f32 %v751_v46, 0.0  ;;  %v665_v55 = vpop.f32.mrb[20].mxu0  ;;  %v754_v56 = vpop.f32.mrb[20].mxu1 }
 0x234   : > { %v1492_v57 = vpack.c.bf16 %v769_v49, %v765_v47  ;;  %v1500_v58 = vpack.c.bf16 %v771_v50, %v767_v48  ;;  %v667_v59 = vpop.f32.mrb[21].mxu0  ;;  %v756_v60 = vpop.f32.mrb[21].mxu1  ;;  %v666_v4 = vadd.f32 %v665_v55, %v571_v61  ;;  %v755_v5 = vadd.f32 %v754_v56, %v571_v61 }
 0x235   : > { %v1490_v62 = vpack.c.bf16 %v770_v53, %v766_v51  ;;  %v1498_v63 = vpack.c.bf16 %v772_v54, %v768_v52  ;;  %v668_v6 = vadd.f32 %v667_v59, %v571_v61  ;;  %v757_v7 = vadd.f32 %v756_v60, %v571_v61 }
 0x236   : > { %v773_v23 = vmax.f32 %v666_v4, 0.0  ;;  %v775_v24 = vmax.f32 %v755_v5, 0.0 }
 0x237   : > { %v671_v8 = vpop.f32.mrb[22].mxu0  ;;  %v760_v9 = vpop.f32.mrb[22].mxu1  ;;  %1491 = vmatprep.subr.bf16.mxu0 %v1490_v62  ;;  %1499 = vmatprep.subr.bf16.mxu1 %v1498_v63  ;;  %v774_v27 = vmax.f32 %v668_v6, 0.0  ;;  %v776_v28 = vmax.f32 %v757_v7, 0.0 }
 0x238   : > { %v672_v10 = vadd.f32 %v671_v8, %v576_v1  ;;  %v761_v11 = vadd.f32 %v760_v9, %v576_v1  ;;  %v673_v12 = vpop.f32.mrb[23].mxu0  ;;  %v762_v13 = vpop.f32.mrb[23].mxu1  ;;  %1493 = vmatpush1.bf16.msra.mxu0 %v1492_v57  ;;  %1501 = vmatpush1.bf16.msra.mxu1 %v1500_v58 }
 0x239   : > { %v674_v21 = vadd.f32 %v673_v12, %v576_v1  ;;  %v763_v22 = vadd.f32 %v762_v13, %v576_v1  ;;  %v964_v58 = vpop.permute.xlu0 %963 }
 0x23a   : > { %v777_v25 = vmax.f32 %v672_v10, 0.0  ;;  %v779_v26 = vmax.f32 %v761_v11, 0.0 }
 0x23b   : > { %v778_v29 = vmax.f32 %v674_v21, 0.0  ;;  %v780_v30 = vmax.f32 %v763_v22, 0.0 }
 0x23c   : > { %v1496_v31 = vpack.c.bf16 %v777_v25, %v773_v23  ;;  %v1504_v32 = vpack.c.bf16 %v779_v26, %v775_v24 }
 0x23d   : > { %v1494_v14 = vpack.c.bf16 %v778_v29, %v774_v27  ;;  %v1502_v15 = vpack.c.bf16 %v780_v30, %v776_v28 }
 0x23f   : > { %1495 = vmatprep.subr.bf16.mxu0 %v1494_v14  ;;  %1503 = vmatprep.subr.bf16.mxu1 %v1502_v15 }
 0x240   : > { %1497 = vmatpush1.bf16.msra.mxu0 %v1496_v31  ;;  %1505 = vmatpush1.bf16.msra.mxu1 %v1504_v32 }
 0x243   : > { %1437 = vmatmul.mubr.msk.f32.vlgmr.msra.gmra.mrb[24].mxu0 %vm793_vm3, %v2007_v18  ;;  %1439 = vmatmul.mubr.msk.f32.vlgmr.msra.gmra.mrb[24].mxu1 %vm793_vm3, %v2007_v18 }
 0x244   : > { %868 = vmatprep.mubr.f32.mxu0 %v1784_v0  ;;  %945 = vmatprep.mubr.f32.mxu1 %v1784_v0 }
 0x247   : > { %1438 = vmatmul.mubr.msk.f32.gmra.mrb[26].mxu0 %vm793_vm3, %v2009_v19  ;;  %1440 = vmatmul.mubr.msk.f32.gmra.mrb[26].mxu1 %vm793_vm3, %v2009_v19 }
 0x248   : > { %1033 = vmatprep.mubr.f32.mxu0 %v1784_v0  ;;  %1104 = vmatprep.mubr.f32.mxu1 %v1784_v0 }
 0x316   : > { %v864_v33 = vpop.f32.mrb[24].mxu0  ;;  %v941_v34 = vpop.f32.mrb[24].mxu1 }
 0x317   : > { %v866_v35 = vpop.f32.mrb[25].mxu0  ;;  %v943_v36 = vpop.f32.mrb[25].mxu1  ;;  %v865_v38 = vadd.f32 %v864_v33, %v786_v37  ;;  %v942_v18 = vadd.f32 %v941_v34, %v786_v37 }
 0x318   : > { %v867_v39 = vadd.f32 %v866_v35, %v786_v37  ;;  %v944_v40 = vadd.f32 %v943_v36, %v786_v37 }
 0x319   : > { %v952_v47 = vmax.f32 %v865_v38, 0.0  ;;  %v954_v0 = vmax.f32 %v942_v18, 0.0 }
 0x31a   : > { %v870_v41 = vpop.f32.mrb[26].mxu0  ;;  %v947_v42 = vpop.f32.mrb[26].mxu1  ;;  %v953_v50 = vmax.f32 %v867_v39, 0.0  ;;  %v955_v51 = vmax.f32 %v944_v40, 0.0 }
 0x31b   : > { %v871_v43 = vadd.f32 %v870_v41, %v791_v16  ;;  %v948_v44 = vadd.f32 %v947_v42, %v791_v16  ;;  %v872_v17 = vpop.f32.mrb[27].mxu0  ;;  %v949_v19 = vpop.f32.mrb[27].mxu1 }
 0x31c   : > { %v873_v45 = vadd.f32 %v872_v17, %v791_v16  ;;  %v950_v46 = vadd.f32 %v949_v19, %v791_v16 }
 0x31d   : > { %v956_v48 = vmax.f32 %v871_v43, 0.0  ;;  %v958_v49 = vmax.f32 %v948_v44, 0.0 }
 0x31e   : > { %v957_v52 = vmax.f32 %v873_v45, 0.0  ;;  %v959_v53 = vmax.f32 %v950_v46, 0.0 }
 0x31f   : > { %v1508_v54 = vpack.c.bf16 %v956_v48, %v952_v47  ;;  %v1512_v55 = vpack.c.bf16 %v958_v49, %v954_v0 }
 0x320   : > { %v1506_v56 = vpack.c.bf16 %v957_v52, %v953_v50  ;;  %v1510_v57 = vpack.c.bf16 %v959_v53, %v955_v51 }
 0x322   : > { %1507 = vmatprep.subr.bf16.mxu0 %v1506_v56  ;;  %1511 = vmatprep.subr.bf16.mxu1 %v1510_v57 }
 0x323   : > { %1509 = vmatpush1.bf16.msra.mxu0 %v1508_v54  ;;  %1513 = vmatpush1.bf16.msra.mxu1 %v1512_v55 }
 0x326   : > { %1441 = vmatmul.mubr.msk.f32.vlgmr.msra.gmra.mrb[28].mxu0 %vm966_vm4, %v2017_v20  ;;  %1442 = vmatmul.mubr.msk.f32.vlgmr.msra.gmra.mrb[28].mxu1 %vm966_vm4, %v2017_v20 }
 0x3f9   : > { %v1035_v59 = vpop.f32.mrb[28].mxu0  ;;  %v1106_v60 = vpop.f32.mrb[28].mxu1 }
 0x3fa   : > { %v1036_v61 = vadd.f32 %v1035_v59, %v964_v58  ;;  %v1107_v62 = vadd.f32 %v1106_v60, %v964_v58  ;;  %v1037_v63 = vpop.f32.mrb[29].mxu0  ;;  %v1108_v1 = vpop.f32.mrb[29].mxu1 }
 0x3fb   : > { %v1038_v4 = vadd.f32 %v1037_v63, %v964_v58  ;;  %v1109_v5 = vadd.f32 %v1108_v1, %v964_v58 }
 0x3fc   : > { %v1111_v6 = vsel %vm287_vm0, %v1036_v61, -inf  ;;  %v1125_v7 = vsel %vm287_vm0, %v1107_v62, -inf  ;;  %v1443_v41 = vmul.f32 -1.442695, %v1036_v61  ;;  %v1445_v44 = vmul.f32 -1.442695, %v1107_v62 }
 0x3fd   : > { %v1112_v8 = vrot.slane %v1111_v6, 4  ;;  %v1126_v9 = vrot.slane %v1125_v7, 4  ;;  %v1118_v10 = vsel %vm287_vm0, %v1038_v4, -inf  ;;  %v1132_v20 = vsel %vm287_vm0, %v1109_v5, -inf }
 0x3fe   : > { %v1119_v11 = vrot.slane %v1118_v10, 4  ;;  %v1133_v21 = vrot.slane %v1132_v20, 4  ;;  %v1444_v19 = vmul.f32 -1.442695, %v1038_v4  ;;  %v1446_v45 = vmul.f32 -1.442695, %v1109_v5 }
 0x3ff   : > { %v1113_v12 = vmax.f32 %v1111_v6, %v1112_v8  ;;  %v1127_v13 = vmax.f32 %v1125_v7, %v1126_v9 }
 0x400   : > { %v1120_v22 = vmax.f32 %v1118_v10, %v1119_v11  ;;  %v1134_v25 = vmax.f32 %v1132_v20, %v1133_v21 }
 0x401   : > { %v1114_v23 = vrot.slane %v1113_v12, 2  ;;  %v1128_v24 = vrot.slane %v1127_v13, 2 }
 0x402   : > { %v1121_v26 = vrot.slane %v1120_v22, 2  ;;  %v1135_v29 = vrot.slane %v1134_v25, 2 }
 0x403   : > { %v1115_v27 = vmax.f32 %v1113_v12, %v1114_v23  ;;  %v1129_v28 = vmax.f32 %v1127_v13, %v1128_v24 }
 0x404   : > { %v1122_v30 = vmax.f32 %v1120_v22, %v1121_v26  ;;  %v1136_v14 = vmax.f32 %v1134_v25, %v1135_v29 }
 0x405   : > { %v1116_v31 = vrot.slane %v1115_v27, 1  ;;  %v1130_v32 = vrot.slane %v1129_v28, 1 }
 0x406   : > { %v1123_v15 = vrot.slane %v1122_v30, 1  ;;  %v1137_v35 = vrot.slane %v1136_v14, 1 }
 0x407   : > { %v1117_v33 = vmax.f32 %v1115_v27, %v1116_v31  ;;  %v1131_v34 = vmax.f32 %v1129_v28, %v1130_v32 }
 0x408   : > { %v1124_v36 = vmax.f32 %v1122_v30, %v1123_v15  ;;  %v1138_v38 = vmax.f32 %v1136_v14, %v1137_v35  ;;  %v1211_v14 = vcombine.low %v1961_v2, %v1961_v2 }
 0x409   : > { %v1139_v37 = vsub.f32 %v1036_v61, %v1117_v33  ;;  %v1141_v16 = vsub.f32 %v1107_v62, %v1131_v34  ;;  %v1212_v33 = vcombine.low %v1963_v3, %v1963_v3 }
 0x40a   : > { %v1140_v18 = vsub.f32 %v1038_v4, %v1124_v36  ;;  %v1142_v43 = vsub.f32 %v1109_v5, %v1138_v38 }
 0x40b   : > { %v1143_v39 = vmul.f32 1.442695, %v1139_v37  ;;  %v1147_v40 = vmul.f32 1.442695, %v1141_v16 }
 0x40c   : > { %v1145_v42 = vmul.f32 1.442695, %v1140_v18  ;;  %v1149_v17 = vmul.f32 1.442695, %v1142_v43 }
 0x40d   : > { %1586 = vpow2.f32 %v1143_v39 }
 0x40e   : > { %1588 = vpow2.f32 %v1147_v40 }
 0x40f   : > { %1590 = vpow2.f32 %v1145_v42 }
 0x410   : > { %1592 = vpow2.f32 %v1443_v41 }
 0x411   : > { %1594 = vpow2.f32 %v1149_v17 }
 0x412   : > { %1596 = vpow2.f32 %v1445_v44 }
 0x413   : > { %1598 = vpow2.f32 %v1444_v19 }
 0x414   : > { %1600 = vpow2.f32 %v1446_v45 }
 0x417   : > { %v1587_v46 = vpop.eup %1586 }
 0x418   : > { %v1589_v47 = vpop.eup %1588  ;;  %v1151_v0 = vsel %vm287_vm0, %v1587_v46, 0.0 }
 0x419   : > { %v1591_v48 = vpop.eup %1590  ;;  %v1152_v49 = vrot.slane %v1151_v0, 4  ;;  %v1165_v50 = vsel %vm287_vm0, %v1589_v47, 0.0 }
 0x41a   : > { %v1593_v51 = vpop.eup %1592  ;;  %v1166_v52 = vrot.slane %v1165_v50, 4  ;;  %v1158_v53 = vsel %vm287_vm0, %v1591_v48, 0.0 }
 0x41b   : > { %v1595_v54 = vpop.eup %1594  ;;  %v1153_v55 = vadd.f32 %v1152_v49, %v1151_v0  ;;  %v1159_v56 = vrot.slane %v1158_v53, 4  ;;  %v1199_v1 = vadd.f32 1.0, %v1593_v51 }
 0x41c   : > { %v1597_v57 = vpop.eup %1596  ;;  %v1167_v58 = vadd.f32 %v1166_v52, %v1165_v50  ;;  %v1172_v59 = vsel %vm287_vm0, %v1595_v54, 0.0 }
 0x41d   : > { %v1599_v60 = vpop.eup %1598  ;;  %v1154_v61 = vrot.slane %v1153_v55, 2  ;;  %v1160_v62 = vadd.f32 %v1159_v56, %v1158_v53  ;;  %v1173_v63 = vrot.slane %v1172_v59, 4  ;;  %v1201_v6 = vadd.f32 1.0, %v1597_v57 }
 0x41e   : > { %v1168_v4 = vrot.slane %v1167_v58, 2  ;;  %v1200_v10 = vadd.f32 1.0, %v1599_v60  ;;  %v1601_v11 = vpop.eup %1600  ;;  %1602 = vrcp.f32 %v1199_v1 }
 0x41f   : > { %v1155_v5 = vadd.f32 %v1154_v61, %v1153_v55  ;;  %v1161_v7 = vrot.slane %v1160_v62, 2  ;;  %v1174_v8 = vadd.f32 %v1173_v63, %v1172_v59  ;;  %1604 = vrcp.f32 %v1201_v6 }
 0x420   : > { %v1169_v9 = vadd.f32 %v1168_v4, %v1167_v58  ;;  %1606 = vrcp.f32 %v1200_v10  ;;  %v1202_v26 = vadd.f32 1.0, %v1601_v11 }
 0x421   : > { %v1156_v20 = vrot.slane %v1155_v5, 1  ;;  %v1162_v12 = vadd.f32 %v1161_v7, %v1160_v62  ;;  %v1175_v13 = vrot.slane %v1174_v8, 2 }
 0x422   : > { %v1170_v21 = vrot.slane %v1169_v9, 1 }
 0x423   : > { %v1157_v22 = vadd.f32 %v1156_v20, %v1155_v5  ;;  %v1163_v23 = vrot.slane %v1162_v12, 1  ;;  %v1176_v24 = vadd.f32 %v1175_v13, %v1174_v8 }
 0x424   : > { %v1171_v25 = vadd.f32 %v1170_v21, %v1169_v9 }
 0x425   : > { %1608 = vrcp.f32 %v1157_v22  ;;  %v1164_v27 = vadd.f32 %v1163_v23, %v1162_v12  ;;  %v1177_v28 = vrot.slane %v1176_v24, 1 }
 0x426   : > { %1610 = vrcp.f32 %v1171_v25 }
 0x427   : > { %1612 = vrcp.f32 %v1164_v27  ;;  %v1178_v29 = vadd.f32 %v1177_v28, %v1176_v24 }
 0x428   : > { %1614 = vrcp.f32 %v1202_v26  ;;  %v1603_v30 = vpop.eup %1602 }
 0x429   : > { %1616 = vrcp.f32 %v1178_v29  ;;  %v1605_v31 = vpop.eup %1604  ;;  %v1215_v18 = vmul.f32 %v1603_v30, %v1211_v14 }
 0x42a   : > { %v1607_v32 = vpop.eup %1606  ;;  %v1217_v42 = vmul.f32 %v1605_v31, %v1212_v33 }
 0x42b   : > { %v1216_v41 = vmul.f32 %v1607_v32, %v1961_v2 }
 0x42f   : > { %v1609_v15 = vpop.eup %1608 }
 0x430   : > { %v1611_v34 = vpop.eup %1610  ;;  %v1183_v35 = vmul.f32 %v1609_v15, %v1587_v46 }
 0x431   : > { %v1613_v36 = vpop.eup %1612  ;;  %v1185_v37 = vmul.f32 %v1611_v34, %v1589_v47 }
 0x432   : > { %v1615_v16 = vpop.eup %1614  ;;  %v1184_v38 = vmul.f32 %v1613_v36, %v1591_v48  ;;  %v1223_v39 = vrot.slane %v1183_v35, 4 }
 0x433   : > { %v1617_v40 = vpop.eup %1616  ;;  %v1225_v43 = vrot.slane %v1185_v37, 4  ;;  %v1218_v46 = vmul.f32 %v1615_v16, %v1963_v3 }
 0x434   : > { %v1186_v44 = vmul.f32 %v1617_v40, %v1595_v54  ;;  %v1235_v17 = vcombine.low %v1183_v35, %v1184_v38  ;;  %v1224_v19 = vrot.slane %v1184_v38, 4  ;;  %v1231_v45 = vmul.f32 %v1223_v39, %v1215_v18 }
 0x435   : > { %v1233_v48 = vmul.f32 %v1225_v43, %v1217_v42 }
 0x436   : > { %v1236_v47 = vcombine.low %v1185_v37, %v1186_v44  ;;  %1239 = vst [vmem:[%s205_s20] sm:$0xff] %v1235_v17  ;;  %v1226_v2 = vrot.slane %v1186_v44, 4  ;;  %v1232_v0 = vmul.f32 %v1224_v19, %v1216_v41 }
 0x438   : > { %1240 = vst [vmem:[%s205_s20 + $0x8] sm:$0xff] %v1236_v47  ;;  %v1234_v3 = vmul.f32 %v1226_v2, %v1218_v46  ;;  %v1245_v49 = vcombine.high %v1231_v45, %v1232_v0 }
 0x439   : > { %1689 = shalt.err (!%p1686_p7)
}
 0x43a   : > { %s1690_s23 = scalar_lea.hbm %s2075_s5, 256  ;;  %s1694_s7 = scalar_lea.hbm %s2160_s2, 512 }
 0x43b   : > { %p1691_p9 = scmp.ne.s32.totalorder %s2075_s5, %s1690_s23  ;;  %p1695_p0 = scmp.lt.u32.totalorder %s2075_s5, %s2160_s2 }
 0x43c   : > { %p1696_p11 = scmp.lt.u32.totalorder %s1694_s7, %s1690_s23  ;;  %p1698_p4 = scmp.lt.u32.totalorder %s1690_s23, %s2075_s5 }
 0x43d   : > { %p1692_p2 = pnand %p1691_p9, %p1899_p12 }
 0x43e   : > { %p1697_p1 = por %p1696_p11, %p1695_p0 }
 0x43f   : > { %p1693_p5 = pneg %p1692_p2 }
 0x440   : > { %p1699_p6 = por %p1698_p4, %p1697_p1 }
 0x442   : > { %p1700_p8 = pnand %p1699_p6, %p1693_p5 }
 0x444   : > { %1703 = shalt.err (!%p1700_p8)
}
 0x445   : > { %1520 = dma.vmem_to_hbm [thread:$0]  (%p1899_p12), %s2077_s4, 256, %s2075_s5, %s1252_s10   ;;  %v1246_v50 = vcombine.high %v1233_v48, %v1234_v3  ;;  %1249 = vst [vmem:[%s2080_s8] sm:$0xff] %v1245_v49 }
 0x446   : > { %s2111_s27 = scalar_lea.hbm %s2161_s3, %s1456_s18  ;;  %s1257_s28 = scalar_lea.sflag [#allocation9], %s1944_s30 }
 0x447   : > { %1250 = vst [vmem:[%s2080_s8 + $0x8] sm:$0xff] %v1246_v50  ;;  %s1704_s29 = scalar_lea.vmem %s2115_s9, 256  ;;  %s1787_s4 = smov [#allocation8]  }
 0x448   : > { %p1705_p10 = scmp.ne.s32.totalorder %s2115_s9, %s1704_s29  ;;  %s1708_s16 = sshll.u32 %s1787_s4, 4  ;;  %s1709_s16 = int_to_ptr.vmem [resolvable:$false] %s1708_s16 }
 0x449   : > { %s1710_s5 = scalar_lea.vmem %s1709_s16, 512  ;;  %p1711_p7 = scmp.lt.s32.totalorder %s2115_s9, %s1709_s16 }
 0x44a   : > { %p1706_p13 = pnand %p1705_p10, %p1899_p12  ;;  %p1712_p9 = scmp.lt.s32.totalorder %s1710_s5, %s1704_s29 }
 0x44c   : > { %p1707_p3 = pneg %p1706_p13  ;;  %p1713_p2 = por %p1712_p9, %p1711_p7 }
 0x44e   : > { %p1714_p5 = pnand %p1713_p2, %p1707_p3 }
 0x450   : > { %1717 = shalt.err (!%p1714_p5)
}
 0x451   : > { %s1718_s30 = scalar_lea.hbm %s2111_s27, 256  ;;  %s1722_s10 = scalar_lea.hbm %s2161_s3, 512 }
 0x452   : > { %p1719_p0 = scmp.ne.s32.totalorder %s2111_s27, %s1718_s30  ;;  %p1723_p4 = scmp.lt.u32.totalorder %s2111_s27, %s2161_s3 }
 0x453   : > { %p1724_p6 = scmp.lt.u32.totalorder %s1722_s10, %s1718_s30  ;;  %p1726_p10 = scmp.lt.u32.totalorder %s1718_s30, %s2111_s27 }
 0x454   : > { %p1720_p11 = pnand %p1719_p0, %p1899_p12 }
 0x455   : > { %p1725_p8 = por %p1724_p6, %p1723_p4 }
 0x456   : > { %p1721_p1 = pneg %p1720_p11 }
 0x457   : > { %p1727_p13 = por %p1726_p10, %p1725_p8 }
 0x459   : > { %p1728_p3 = pnand %p1727_p13, %p1721_p1 }
 0x45b   : > { %1731 = shalt.err (!%p1728_p3)
}
 0x45c   : > { %1521 = dma.vmem_to_hbm [thread:$0]  (%p1899_p12), %s2115_s9, 256, %s2111_s27, %s1257_s28  }
 0x45d PF: > { %s1297_s6 = sand.u32 1, %s1766_s12   ;;  %p2176_p7 = scmp.ne.s32.totalorder %s2166_s19, 0 }
 0x45e   : > { %p2177_p9 = scmp.ge.s32.totalorder %s1778_s15, 2  ;;  %s1298_s7 = scalar_lea.sflag [#allocation4], %s1297_s6 }
 0x460   : > { %p1533_p2 = pnand %p2177_p9, %p2176_p7 }
 0x462   : > { %1757 = dma.done.wait (!%p1533_p2), %s1298_s7, 256  }
 0x463   : > { %1759 = vsyncadd (!%p1533_p2), %s1298_s7, 4294967040  ;;  %s1307_s20 = scalar_lea.sflag [#allocation9], %s1297_s6 }
 0x464   : > { %1761 = dma.done.wait (!%p1533_p2), %s1307_s20, 256  }
 0x465   : > { %1763 = vsyncadd (!%p1533_p2), %s1307_s20, 4294967040  ;;  %p21_p12 = scmp.ge.s32.totalorder %s1864_s24, 4   ;;  %s2178_s12 = smov %s1770_s13 }
 0x466   : > { %s2179_s13 = smov %s1774_s14  ;;  %s2180_s14 = smov %s1895_s17 }
 0x467   : > { %s2181_s15 = smov %s1864_s24  ;;  %23 = sbr.rel (!%p21_p12) target bundleno = 8 (0x8), region = 94 }
 0x46e   :  { %1312 = vsyncpa [#allocation3], 1 }
 0x46f   :  { %1314 = vsyncpa [#allocation3 + $0x1], 1 }
 0x470   :  { %1315 = vsyncpa [#allocation6], 1 }
 0x471   :  { %1316 = vsyncpa [#allocation4], 1 }
 0x472   :  { %1318 = vsyncpa [#allocation4 + $0x1], 1 }
 0x473   :  { %1319 = vsyncpa [#allocation9], 1 }
 0x474   :  { %1321 = vsyncpa [#allocation9 + $0x1], 1 }

</bundles_post_ra>
